<compile_context>
chip_gen: v7x
topology: tpu7x:2x2x1
jax: 0.10.0
libtpu: 0.0.40
codegen_flags: <defaults>
</compile_context>

<pallas_src>
import jax
import jax.numpy as jnp
from jax.experimental import pallas as pl
from jax.experimental.pallas import tpu as pltpu


def _round_up(x, m):
    return (x + m - 1) // m * m


def _vmem_capacity_bytes():
    try:
        return int(pltpu.get_tpu_info().vmem_capacity_bytes)
    except Exception:
        return 64 << 20          # conservative default (v7x per-TC VMEM)


def _make_kernel(mxu_dtype):
    def kernel(sp_ref, x_ref, w1_ref, b1_ref, w2_ref, b2_ref, o_ref, acc_ref):
        k = pl.program_id(1)

        @pl.when(k == 0)
        def _():
            acc_ref[...] = jnp.zeros_like(acc_ref)

        x = x_ref[...]
        # linear1 (H-chunk): [bm, Dp] @ [Dp, th] + [1, th]   (MXU, f32 accumulate)
        eta = jnp.dot(x.astype(mxu_dtype), w1_ref[...],
                      preferred_element_type=jnp.float32) + b1_ref[...]
        # swish #1 (its 1/1.1 scale is folded into W2 at param-prep time).
        a1 = eta * jax.nn.sigmoid(eta * sp_ref[0])
        # partial linear2: [bm, th] @ [th, Dp], accumulated over H-chunks.
        acc_ref[...] += jnp.dot(a1.astype(mxu_dtype), w2_ref[...],
                                preferred_element_type=jnp.float32)

        @pl.when(k == pl.num_programs(1) - 1)
        def _():
            eta2 = acc_ref[...] + b2_ref[...]
            # dropout(drop_rate=0.0) is the identity -> nothing to do.
            a2 = eta2 * jax.nn.sigmoid(eta2 * sp_ref[1]) * (1.0 / 1.1)
            o_ref[...] = (x.astype(jnp.float32) + a2).astype(o_ref.dtype)

    return kernel


def resblock_prepare_params(w1, b1, beta1, w2, b2, beta2, *,
                            mxu_dtype=jnp.bfloat16):
    """One-time parameter preparation, reused across forward calls.

    w1:[D,H] (=linear1.weight^T), b1:[H], w2:[H,D] (=linear2.weight^T), b2:[D],
    beta1/beta2:[1].  Pads feature dims to multiples of 128 (lane-dense),
    casts only the MXU operands, folds swish1's 1/1.1 into W2 and precomputes
    softplus(beta) once (numerically stable).
    """
    D, H = w1.shape
    assert w2.shape == (H, D) and b1.shape == (H,) and b2.shape == (D,)
    mxu_dtype = jnp.dtype(mxu_dtype)
    f32 = jnp.float32
    Dp = _round_up(D, 128)
    Hp = _round_up(H, 128)

    w1_p = jnp.zeros((Dp, Hp), mxu_dtype).at[:D, :H].set(w1.astype(mxu_dtype))
    w2_scaled = (w2.astype(f32) * (1.0 / 1.1)).astype(mxu_dtype)   # fold swish1 scale
    w2_p = jnp.zeros((Hp, Dp), mxu_dtype).at[:H, :D].set(w2_scaled)
    b1_p = jnp.zeros((1, Hp), f32).at[0, :H].set(b1.astype(f32))
    b2_p = jnp.zeros((1, Dp), f32).at[0, :D].set(b2.astype(f32))
    sp = jnp.stack([jax.nn.softplus(beta1.astype(f32)).reshape(()),
                    jax.nn.softplus(beta2.astype(f32)).reshape(())])
    return dict(w1=w1_p, b1=b1_p, w2=w2_p, b2=b2_p, sp=sp,
                D=D, H=H, Dp=Dp, Hp=Hp, mxu_dtype=mxu_dtype)


def resblock_forward(x, params, *, bm=None, h_tile=None):
    """x:[B,D] -> [B,D] in x.dtype, using prepared params."""
    B, D = x.shape
    assert D == params["D"]
    Dp, Hp = params["Dp"], params["Hp"]
    mxu_dtype = params["mxu_dtype"]
    xb = jnp.dtype(x.dtype).itemsize
    wb = jnp.dtype(mxu_dtype).itemsize
    sub = 16 if xb == 2 else 8

    # Balanced batch tiles (cap ~512 rows); ensure >= 2 tiles when B >= 2*sub
    # so the "parallel" batch axis can shard across v7x's two TensorCores.
    if bm is None:
        n_tiles = pl.cdiv(B, 512)
        bm = _round_up(pl.cdiv(B, n_tiles), sub)
        if pl.cdiv(B, bm) == 1 and B >= 2 * sub:
            bm = _round_up(pl.cdiv(B, 2), sub)
    assert bm % sub == 0
    n_b = pl.cdiv(B, bm)

    vmem_cap = _vmem_capacity_bytes()
    budget = int(0.6 * vmem_cap)         # headroom for Mosaic scratch

    def vmem_usage(th):
        weights = 2 * (Dp * th + th * Dp) * wb     # double-buffered W1/W2 blocks
        biases = 2 * (th + Dp) * 4
        io = 2 * 2 * bm * Dp * xb                  # x + out tiles, double-buffered
        acc = bm * Dp * 4                          # f32 accumulator scratch
        live = 2 * bm * th * 4                     # eta / a1 f32 intermediates
        return weights + biases + io + acc + live

    # H-chunk size: whole Hp if it fits the budget, else the largest multiple
    # of 128 that divides Hp and fits (falls back to 128).
    if h_tile is None:
        th = 128
        hp_blocks = Hp // 128
        for nk in range(1, hp_blocks + 1):
            if hp_blocks % nk:
                continue
            cand = (hp_blocks // nk) * 128
            if vmem_usage(cand) <= budget:
                th = cand
                break
    else:
        th = h_tile
        assert th % 128 == 0 and Hp % th == 0
    n_k = Hp // th

    vmem_limit = int(min(max(32 << 20, int(1.25 * vmem_usage(th))),
                         int(0.85 * vmem_cap)))

    # Only the feature (contraction/residual) dim of x needs zero padding for
    # exactness; fast path when D is already a multiple of 128.  Batch is
    # never padded: the last grid tile is partial and Pallas masks its writes.
    pad_d = Dp != D
    x_in = jnp.pad(x, ((0, 0), (0, Dp - D))) if pad_d else x

    out = pl.pallas_call(
        _make_kernel(mxu_dtype),
        out_shape=jax.ShapeDtypeStruct((B, Dp), x.dtype),
        grid=(n_b, n_k),
        in_specs=[
            pl.BlockSpec(memory_space=pltpu.MemorySpace.SMEM),   # softplus(beta) scalars
            pl.BlockSpec((bm, Dp), lambda i, k: (i, 0)),         # x tile (resident over k)
            pl.BlockSpec((Dp, th), lambda i, k: (0, k)),         # W1, N-sliced over H
            pl.BlockSpec((1, th), lambda i, k: (0, k)),          # b1
            pl.BlockSpec((th, Dp), lambda i, k: (k, 0)),         # W2, K-sliced over H
            pl.BlockSpec((1, Dp), lambda i, k: (0, 0)),          # b2
        ],
        out_specs=pl.BlockSpec((bm, Dp), lambda i, k: (i, 0)),
        scratch_shapes=[pltpu.VMEM((bm, Dp), jnp.float32)],
        compiler_params=pltpu.CompilerParams(
            dimension_semantics=("parallel", "arbitrary"),
            vmem_limit_bytes=vmem_limit),
    )(params["sp"], x_in, params["w1"], params["b1"], params["w2"], params["b2"])

    return out[:, :D] if pad_d else out


# ----------------------------- references ----------------------------------

def resblock_reference(x, w1, b1, beta1, w2, b2, beta2):
    def swish(z, beta):
        return (z * jax.nn.sigmoid(z * jax.nn.softplus(beta))) / 1.1
    eta = x @ w1 + b1
    eta = swish(eta, beta1) @ w2 + b2
    return x + swish(eta, beta2)


def resblock_reference_prepared(x, params):
    """Mirrors the kernel's exact arithmetic (padding, mxu casts, folded 1/1.1)."""
    f32 = jnp.float32
    mxu = params["mxu_dtype"]
    D, Dp = params["D"], params["Dp"]
    xp = jnp.pad(x, ((0, 0), (0, Dp - D))) if Dp != D else x
    sp = params["sp"]
    eta = jnp.dot(xp.astype(mxu), params["w1"],
                  preferred_element_type=f32) + params["b1"]
    a1 = eta * jax.nn.sigmoid(eta * sp[0])
    eta2 = jnp.dot(a1.astype(mxu), params["w2"],
                   preferred_element_type=f32) + params["b2"]
    a2 = eta2 * jax.nn.sigmoid(eta2 * sp[1]) * (1.0 / 1.1)
    out = (xp.astype(f32) + a2).astype(x.dtype)
    return out[:, :D] if Dp != D else out


def _init(key, D, H):
    k1, k2, k3, k4 = jax.random.split(key, 4)
    lim1 = 1.0 / jnp.sqrt(D)
    lim2 = 1.0 / jnp.sqrt(H)
    w1 = jax.random.uniform(k1, (D, H), jnp.float32, -lim1, lim1)   # linear1.weight^T
    b1 = jax.random.uniform(k2, (H,), jnp.float32, -lim1, lim1)     # linear1.bias
    w2 = jax.random.uniform(k3, (H, D), jnp.float32, -lim2, lim2)   # linear2.weight^T
    b2 = jax.random.uniform(k4, (D,), jnp.float32, -lim2, lim2)     # linear2.bias
    beta1 = jnp.full((1,), 0.5, jnp.float32)
    beta2 = jnp.full((1,), 0.5, jnp.float32)
    return w1, b1, beta1, w2, b2, beta2


if __name__ == "__main__":
    key = jax.random.PRNGKey(0)
    kp1, kp2, kx1, kx2 = jax.random.split(key, 4)

    # Case 1: small non-128 feature dims (padding path).  f32 MXU operands for
    # a tight semantic check, then the default bf16 MXU path.
    B, D, H = 16, 32, 64
    w1, b1, beta1, w2, b2, beta2 = _init(kp1, D, H)
    x = jax.random.normal(kx1, (B, D), jnp.float32)
    ref = resblock_reference(x, w1, b1, beta1, w2, b2, beta2)

    params_f32 = resblock_prepare_params(w1, b1, beta1, w2, b2, beta2,
                                         mxu_dtype=jnp.float32)
    out = jax.block_until_ready(resblock_forward(x, params_f32))
    assert out.shape == ref.shape
    assert jnp.allclose(out, ref, atol=2e-3, rtol=2e-3), "f32 path mismatch"

    params_bf16 = resblock_prepare_params(w1, b1, beta1, w2, b2, beta2)  # bf16 MXU
    out_bf = jax.block_until_ready(resblock_forward(x, params_bf16))
    assert jnp.allclose(out_bf, resblock_reference_prepared(x, params_bf16),
                        atol=5e-3, rtol=5e-3), "bf16 kernel mismatch"
    assert jnp.allclose(out_bf, ref, atol=1e-1, rtol=1e-1), "bf16 semantics off"

    # Case 2: lane-aligned D (fast path: no x pad / output slice), ragged batch
    # (partial last tile), forced H-tiling (2 chunks) to exercise the
    # accumulator + pl.when finalize path.
    B2, D2, H2 = 19, 128, 256
    w1, b1, beta1, w2, b2, beta2 = _init(kp2, D2, H2)
    x2 = jax.random.normal(kx2, (B2, D2), jnp.float32)
    params2 = resblock_prepare_params(w1, b1, beta1, w2, b2, beta2)
    out2 = jax.block_until_ready(resblock_forward(x2, params2, h_tile=128))
    ref2 = resblock_reference(x2, w1, b1, beta1, w2, b2, beta2)
    assert out2.shape == ref2.shape
    assert jnp.allclose(out2, resblock_reference_prepared(x2, params2),
                        atol=5e-3, rtol=5e-3), "H-tiled kernel mismatch"
    assert jnp.allclose(out2, ref2, atol=1e-1, rtol=1e-1), "fast-path semantics off"

    print("KERNEL_OK")
</pallas_src>

<mosaic_0001>
module attributes {stable_mosaic.version = 11 : i64} {
  func.func @kernel(%arg0: i32, %arg1: i32, %arg2: memref<2xf32, #tpu.memory_space<smem>>, %arg3: memref<8x128xf32, #tpu.memory_space<vmem>>, %arg4: memref<128x128xf32, #tpu.memory_space<vmem>>, %arg5: memref<1x128xf32, #tpu.memory_space<vmem>>, %arg6: memref<128x128xf32, #tpu.memory_space<vmem>>, %arg7: memref<1x128xf32, #tpu.memory_space<vmem>>, %arg8: memref<8x128xf32, #tpu.memory_space<vmem>>, %arg9: memref<8x128xf32, #tpu.memory_space<vmem>>) attributes {dimension_semantics = [#tpu.dimension_semantics<parallel>, #tpu.dimension_semantics<arbitrary>], iteration_bounds = array<i64: 2, 1>, scalar_prefetch = 0 : i64, scratch_operands = 1 : i64, tpu.core_type = #tpu.core_type<tc>, window_params = [{transform_indices = @transform_0, window_bounds = array<i64: 2>}, {transform_indices = @transform_1, window_bounds = array<i64: 8, 128>}, {transform_indices = @transform_2, window_bounds = array<i64: 128, 128>}, {transform_indices = @transform_3, window_bounds = array<i64: 1, 128>}, {transform_indices = @transform_4, window_bounds = array<i64: 128, 128>}, {pipeline_mode = #tpu.pipeline_mode<synchronous>, transform_indices = @transform_5, window_bounds = array<i64: 1, 128>}, {transform_indices = @transform_6, window_bounds = array<i64: 8, 128>}]} {
    %c0_i32 = arith.constant 0 : i32
    %0 = arith.cmpi eq, %arg1, %c0_i32 : i32
    %1 = arith.extui %0 : i1 to i32
    %c0_i32_0 = arith.constant 0 : i32
    %2 = arith.cmpi ne, %1, %c0_i32_0 : i32
    scf.if %2 {
      %cst_17 = arith.constant 0.000000e+00 : f32
      %26 = vector.broadcast %cst_17 : f32 to vector<8x128xf32>
      %c0_18 = arith.constant 0 : index
      %c0_19 = arith.constant 0 : index
      %27 = vector.load %arg9[%c0_18, %c0_19] : memref<8x128xf32, #tpu.memory_space<vmem>>, vector<8x128xf32>
      tpu.vector_store %arg9[%c0_18, %c0_19], %26 {strides = array<i32>} : memref<8x128xf32, #tpu.memory_space<vmem>>, vector<8x128xf32>,
    } else {
    }
    %c0 = arith.constant 0 : index
    %c0_1 = arith.constant 0 : index
    %3 = vector.load %arg3[%c0, %c0_1] : memref<8x128xf32, #tpu.memory_space<vmem>>, vector<8x128xf32>
    %c0_2 = arith.constant 0 : index
    %c0_3 = arith.constant 0 : index
    %4 = vector.load %arg4[%c0_2, %c0_3] : memref<128x128xf32, #tpu.memory_space<vmem>>, vector<128x128xf32>
    %cst = arith.constant dense<0.000000e+00> : vector<8x128xf32>
    %5 = tpu.matmul %3, %4, %cst {dimension_numbers = #tpu.dot_dimension_numbers<[1], [0], [0], [1], [0, 0, 1, 1], [], []>} : vector<8x128xf32>, vector<128x128xf32>, vector<8x128xf32> -> vector<8x128xf32>
    %c0_4 = arith.constant 0 : index
    %c0_5 = arith.constant 0 : index
    %6 = vector.load %arg5[%c0_4, %c0_5] : memref<1x128xf32, #tpu.memory_space<vmem>>, vector<1x128xf32>
    %7 = vector.broadcast %6 : vector<1x128xf32> to vector<8x128xf32>
    %8 = arith.addf %5, %7 : vector<8x128xf32>
    %c0_6 = arith.constant 0 : index
    %9 = memref.load %arg2[%c0_6] : memref<2xf32, #tpu.memory_space<smem>>
    %10 = vector.broadcast %9 : f32 to vector<8x128xf32>
    %11 = arith.mulf %8, %10 : vector<8x128xf32>
    %12 = arith.negf %11 : vector<8x128xf32>
    %13 = math.exp %12 : vector<8x128xf32>
    %cst_7 = arith.constant 1.000000e+00 : f32
    %14 = vector.broadcast %cst_7 : f32 to vector<8x128xf32>
    %15 = arith.addf %14, %13 : vector<8x128xf32>
    %16 = arith.divf %14, %15 : vector<8x128xf32>
    %17 = arith.mulf %8, %16 : vector<8x128xf32>
    %c0_8 = arith.constant 0 : index
    %c0_9 = arith.constant 0 : index
    %18 = vector.load %arg9[%c0_8, %c0_9] : memref<8x128xf32, #tpu.memory_space<vmem>>, vector<8x128xf32>
    %c0_10 = arith.constant 0 : index
    %c0_11 = arith.constant 0 : index
    %19 = vector.load %arg6[%c0_10, %c0_11] : memref<128x128xf32, #tpu.memory_space<vmem>>, vector<128x128xf32>
    %cst_12 = arith.constant dense<0.000000e+00> : vector<8x128xf32>
    %20 = tpu.matmul %17, %19, %cst_12 {dimension_numbers = #tpu.dot_dimension_numbers<[1], [0], [0], [1], [0, 0, 1, 1], [], []>} : vector<8x128xf32>, vector<128x128xf32>, vector<8x128xf32> -> vector<8x128xf32>
    %21 = arith.addf %18, %20 : vector<8x128xf32>
    %c0_13 = arith.constant 0 : index
    %c0_14 = arith.constant 0 : index
    %22 = vector.load %arg9[%c0_13, %c0_14] : memref<8x128xf32, #tpu.memory_space<vmem>>, vector<8x128xf32>
    tpu.vector_store %arg9[%c0_13, %c0_14], %21 {strides = array<i32>} : memref<8x128xf32, #tpu.memory_space<vmem>>, vector<8x128xf32>,
    %c0_i32_15 = arith.constant 0 : i32
    %23 = arith.cmpi eq, %arg1, %c0_i32_15 : i32
    %24 = arith.extui %23 : i1 to i32
    %c0_i32_16 = arith.constant 0 : i32
    %25 = arith.cmpi ne, %24, %c0_i32_16 : i32
    scf.if %25 {
      %c0_17 = arith.constant 0 : index
      %c0_18 = arith.constant 0 : index
      %26 = vector.load %arg9[%c0_17, %c0_18] : memref<8x128xf32, #tpu.memory_space<vmem>>, vector<8x128xf32>
      %c0_19 = arith.constant 0 : index
      %c0_20 = arith.constant 0 : index
      %27 = vector.load %arg7[%c0_19, %c0_20] : memref<1x128xf32, #tpu.memory_space<vmem>>, vector<1x128xf32>
      %28 = vector.broadcast %27 : vector<1x128xf32> to vector<8x128xf32>
      %29 = arith.addf %26, %28 : vector<8x128xf32>
      %c1 = arith.constant 1 : index
      %30 = memref.load %arg2[%c1] : memref<2xf32, #tpu.memory_space<smem>>
      %31 = vector.broadcast %30 : f32 to vector<8x128xf32>
      %32 = arith.mulf %29, %31 : vector<8x128xf32>
      %33 = arith.negf %32 : vector<8x128xf32>
      %34 = math.exp %33 : vector<8x128xf32>
      %cst_21 = arith.constant 1.000000e+00 : f32
      %35 = vector.broadcast %cst_21 : f32 to vector<8x128xf32>
      %36 = arith.addf %35, %34 : vector<8x128xf32>
      %37 = arith.divf %35, %36 : vector<8x128xf32>
      %38 = arith.mulf %29, %37 : vector<8x128xf32>
      %cst_22 = arith.constant 0.909090936 : f32
      %39 = vector.broadcast %cst_22 : f32 to vector<8x128xf32>
      %40 = arith.mulf %38, %39 : vector<8x128xf32>
      %41 = arith.addf %3, %40 : vector<8x128xf32>
      %c0_23 = arith.constant 0 : index
      %c0_24 = arith.constant 0 : index
      %42 = vector.load %arg8[%c0_23, %c0_24] : memref<8x128xf32, #tpu.memory_space<vmem>>, vector<8x128xf32>
      tpu.vector_store %arg8[%c0_23, %c0_24], %41 {strides = array<i32>} : memref<8x128xf32, #tpu.memory_space<vmem>>, vector<8x128xf32>,
    } else {
    }
    return
  }
  func.func @transform_0(%arg0: i32, %arg1: i32) -> i32 {
    %c0_i32 = arith.constant 0 : i32
    %c0_i32_0 = arith.constant 0 : i32
    return %c0_i32 : i32
  }
  func.func @transform_1(%arg0: i32, %arg1: i32) -> (i32, i32) {
    %c0_i32 = arith.constant 0 : i32
    %c0_i32_0 = arith.constant 0 : i32
    return %arg0, %c0_i32 : i32, i32
  }
  func.func @transform_2(%arg0: i32, %arg1: i32) -> (i32, i32) {
    %c0_i32 = arith.constant 0 : i32
    %c0_i32_0 = arith.constant 0 : i32
    return %c0_i32, %arg1 : i32, i32
  }
  func.func @transform_3(%arg0: i32, %arg1: i32) -> (i32, i32) {
    %c0_i32 = arith.constant 0 : i32
    %c0_i32_0 = arith.constant 0 : i32
    return %c0_i32, %arg1 : i32, i32
  }
  func.func @transform_4(%arg0: i32, %arg1: i32) -> (i32, i32) {
    %c0_i32 = arith.constant 0 : i32
    %c0_i32_0 = arith.constant 0 : i32
    return %arg1, %c0_i32 : i32, i32
  }
  func.func @transform_5(%arg0: i32, %arg1: i32) -> (i32, i32) {
    %c0_i32 = arith.constant 0 : i32
    %c0_i32_0 = arith.constant 0 : i32
    %c0_i32_1 = arith.constant 0 : i32
    return %c0_i32, %c0_i32_0 : i32, i32
  }
  func.func @transform_6(%arg0: i32, %arg1: i32) -> (i32, i32) {
    %c0_i32 = arith.constant 0 : i32
    %c0_i32_0 = arith.constant 0 : i32
    return %arg0, %c0_i32 : i32, i32
  }
}

</mosaic_0001>

<bundles_post_ra>
// kernel: tpu_custom_call.1
= control target key start
LH: loop header
LB: loop body
LE: loop exit
PB: predicated region body
PF: predicated region fallthrough
CT: control target
= control target key end

     0   :  { %s1529_s0 = inlined_call_operand.hbm [shape: f32[2], index: 0, kind: input, shape index: {}]   ;;  %s1530_s1 = inlined_call_operand.hbm [shape: f32[16,128], index: 1, kind: input, shape index: {}]   ;;  %s1531_s2 = inlined_call_operand.hbm [shape: f32[128,128], index: 2, kind: input, shape index: {}]   ;;  %s1532_s3 = inlined_call_operand.vmem [shape: f32[1,128], index: 3, kind: input, shape index: {}]   ;;  %s1533_s4 = inlined_call_operand.hbm [shape: f32[128,128], index: 4, kind: input, shape index: {}]   ;;  %s1534_s5 = inlined_call_operand.vmem [shape: f32[1,128], index: 5, kind: input, shape index: {}]   ;;  %s1535_s6 = inlined_call_operand.hbm [shape: f32[16,128], index: 6, kind: output, shape index: {}]  }
   0x1   :  { %1543 = sst [smem:[#allocation18_spill]] %s1535_s6 }
   0x2   :  { %11 = vsyncpa [#allocation6], 0 }
   0x3   :  { %12 = vsyncpa [#allocation4], 0 }
   0x4   :  { %14 = vsyncpa [#allocation4 + $0x1], 0 }
   0x5   :  { %15 = vsyncpa [#allocation9], 0 }
   0x6   :  { %16 = vsyncpa [#allocation5], 0 }
   0x7   :  { %18 = vsyncpa [#allocation5 + $0x1], 0  ;;  %s1231_s21 = smov 0   ;;  %s1233_s22 = smov 0  }
   0x8   :  { %s1235_s23 = smov 0   ;;  %s1237_s24 = smov 0  }
   0x9   :  { %s1239_s25 = smov 0   ;;  %s1241_s26 = smov 0  }
   0xa LB: > { %1544 = sst [smem:[#allocation16_spill]] %s1164_s21  ;;  %s712_s27 = sadd.s32 4294967295, %s1184_s26   ;;  %s1184_s26 = sphi %s1241_s26, %s24_s26   ;;  %s1180_s25 = sphi %s1239_s25, %s1568_s25   ;;  %s1176_s24 = sphi %s1237_s24, %s1567_s24   ;;  %s1172_s23 = sphi %s1235_s23, %s1566_s23   ;;  %s1168_s22 = sphi %s1233_s22, %s1565_s22   ;;  %s1164_s21 = sphi %s1231_s21, %s1564_s21  }
   0xb   : > { %s713_s28 = sadd.s32 4294967294, %s1184_s26   ;;  %p77_p0 = scmp.ne.s32.totalorder %s1168_s22, %s1164_s21 }
   0xc   : > { %p1265_p1 = scmp.eq.s32.totalorder %s712_s27, 0  ;;  %p1269_p2 = scmp.eq.s32.totalorder %s712_s27, 1 }
   0xd   : > { %p206_p3 = scmp.eq.s32.totalorder %s713_s28, 1  ;;  %p714_p5 = scmp.ge.s32.totalorder %s1184_s26, 1 }
   0xe   : > { %s1545_s29 = scalar_select %p1265_p1, 1, 0 }
   0xf   : > { %s1546_s30 = scalar_select %p1269_p2, 1, 0 }
  0x10   : > { %p1275_p4 = por %p1265_p1, %p77_p0  ;;  %p1280_p6 = por %p206_p3, %p77_p0 }
  0x11   : > { %p213_p7 = scmp.lt.s32.totalorder %s1184_s26, 3  ;;  %s1186_s10 = smov [#allocation8]  }
  0x12   : > { %s1547_s7 = scalar_select %p1275_p4, 1, 0 }
  0x13   : > { %s1548_s8 = scalar_select %p1280_p6, 1, 0 }
  0x14   : > { %p1285_p8 = pnand %p714_p5, %p213_p7  ;;  %s236_s11 = sshll.u32 %s1186_s10, 4  ;;  %s237_s11 = int_to_ptr.vmem [resolvable:$true] %s236_s11 }
  0x15   : > { %1549 = sst [smem:[#allocation17_spill]] %s1548_s8  ;;  %s1187_s13 = smov [#allocation10]  }
  0x16   : > { %s1550_s9 = scalar_select %p1285_p8, 1, 0 }
  0x17   : > { %p905_p9 = pneg %p1285_p8  ;;  %s1298_s14 = sshll.u32 %s1187_s13, 4  ;;  %s259_s14 = int_to_ptr.vmem [resolvable:$true] %s1298_s14 }
  0x18   : > { %s995_s17 = scalar_lea.hbm %s1531_s2, 2048 }
  0x19   : > { %p1294_p11 = pnand %p905_p9, %p1265_p1  ;;  %p996_p12 = scmp.ne.s32.totalorder %s1531_s2, %s995_s17 }
  0x1a   : > { %p1002_p5 = scmp.lt.u32.totalorder %s995_s17, %s1531_s2 }
  0x1b   : > { %p1308_p13 = pneg %p1294_p11 }
  0x1d   : > { %p998_p0 = pnand %p1308_p13, %p996_p12 }
  0x1f   : > { %p999_p3 = pneg %p998_p0 }
  0x21   : > { %p1004_p7 = pnand %p1002_p5, %p999_p3 }
  0x23   : > { %1007 = shalt.err (!%p1004_p7)
}
  0x24   : > { %s1008_s10 = scalar_lea.vmem %s237_s11, 2048  ;;  %p1016_p4 = scmp.lt.s32.totalorder %s237_s11, %s237_s11 }
  0x25   : > { %p1009_p9 = scmp.ne.s32.totalorder %s237_s11, %s1008_s10  ;;  %p1017_p1 = scmp.lt.s32.totalorder %s1008_s10, %s1008_s10 }
  0x27   : > { %p1011_p10 = pnand %p1009_p9, %p1308_p13  ;;  %p1018_p8 = por %p1017_p1, %p1016_p4 }
  0x29   : > { %p1012_p6 = pneg %p1011_p10 }
  0x2b   : > { %p1019_p2 = pnand %p1018_p8, %p1012_p6 }
  0x2d   : > { %1022 = shalt.err (!%p1019_p2)
}
  0x2e   : > { %s1188_s13 = smov 128   ;;  %s1189_s15 = smov 8  }
  0x2f   : > { %911 = dma.hbm_to_vmem [thread:$0]  (!%p1294_p11), %s1531_s2, 2048, %s237_s11, [#allocation9], %s1188_s13, %s1188_s13, %s1189_s15  }
  0x30   : > { %s1023_s27 = scalar_lea.hbm %s1529_s0, 16 }
  0x31   : > { %p1024_p1 = scmp.ne.s32.totalorder %s1529_s0, %s1023_s27  ;;  %p1030_p6 = scmp.lt.u32.totalorder %s1023_s27, %s1529_s0 }
  0x33   : > { %p1026_p2 = pnand %p1024_p1, %p1308_p13 }
  0x35   : > { %p1027_p4 = pneg %p1026_p2 }
  0x37   : > { %p1032_p8 = pnand %p1030_p6, %p1027_p4 }
  0x39   : > { %1035 = shalt.err (!%p1032_p8)
}
  0x3a   : > { %s1190_s6 = smov [#allocation3]   ;;  %s1036_s19 = scalar_lea.hbm %s1533_s4, 2048 }
  0x3b   : > { %908 = dma.hbm_to_smem (!%p1294_p11), %s1529_s0, 16, %s1190_s6, [#allocation6]  }
  0x3c   : > { %p1037_p10 = scmp.ne.s32.totalorder %s1533_s4, %s1036_s19  ;;  %p1043_p3 = scmp.lt.u32.totalorder %s1036_s19, %s1533_s4 }
  0x3e   : > { %p1039_p12 = pnand %p1037_p10, %p1308_p13 }
  0x40   : > { %p1040_p0 = pneg %p1039_p12 }
  0x42   : > { %p1045_p5 = pnand %p1043_p3, %p1040_p0 }
  0x44   : > { %1048 = shalt.err (!%p1045_p5)
}
  0x45   : > { %s1049_s27 = scalar_lea.vmem %s259_s14, 2048  ;;  %p1057_p2 = scmp.lt.s32.totalorder %s259_s14, %s259_s14 }
  0x46   : > { %p1050_p7 = scmp.ne.s32.totalorder %s259_s14, %s1049_s27  ;;  %p1058_p4 = scmp.lt.s32.totalorder %s1049_s27, %s1049_s27 }
  0x48   : > { %p1052_p9 = pnand %p1050_p7, %p1308_p13  ;;  %p1059_p6 = por %p1058_p4, %p1057_p2 }
  0x4a   : > { %p1053_p1 = pneg %p1052_p9 }
  0x4c   : > { %p1060_p8 = pnand %p1059_p6, %p1053_p1 }
  0x4e   : > { %1063 = shalt.err (!%p1060_p8)
}
  0x4f   : > { %914 = dma.hbm_to_vmem [thread:$0]  (!%p1294_p11), %s1533_s4, 2048, %s259_s14, [#allocation9], %s1188_s13, %s1188_s13, %s1189_s15  }
  0x50   : > { %s64_s20 = sadd.s32 1, %s1172_s23  ;;  %s36_s12 = sadd.s32 1, %s1180_s25 }
  0x51   : > { %p71_p13 = scmp.ne.s32.totalorder %s1172_s23, %s1168_s22  ;;  %p38_p10 = scmp.ge.s32.totalorder %s36_s12, 2 }
  0x52   : > { %p72_p12 = scmp.eq.s32.totalorder %s1184_s26, 0  ;;  %p1553_p0 = scmp.ne.s32.totalorder %s1546_s30, 0 }
  0x53   : > { %p926_p5 = scmp.lt.s32.totalorder %s1184_s26, 2  ;;  %s1570_s12 = smov (%p38_p10, %s36_s12), 0 }
  0x54   : > { %p1372_p3 = por %p1553_p0, %p71_p13  ;;  %p73_p7 = por %p72_p12, %p71_p13 }
  0x55   : > { %s275_s17 = sand.u32 1, %s1172_s23   ;;  %s61_s18 = ssub.s32 %s1180_s25, %s1570_s12 }
  0x56   : > { %p62_p9 = scmp.eq.s32.totalorder %s61_s18, 0  ;;  %s720_s14 = sshll.u32 %s275_s17, 3 }
  0x57   : > { %s721_s13 = sshll.u32 %s1180_s25, 7  ;;  %s279_s10 = scalar_lea.vmem [#allocation7], %s720_s14 }
  0x58   : > { %s1384_s15 = scalar_select %p62_p9, %s1172_s23, %s64_s20  }
  0x59   : > { %s1389_s30 = scalar_lea.hbm %s1530_s1, %s721_s13  ;;  %s286_s21 = sshll.u32 %s279_s10, 4  ;;  %s1391_s21 = int_to_ptr.vmem [resolvable:$true] %s286_s21 }
  0x5a   : > { %p1395_p11 = pnand %p926_p5, %p73_p7  ;;  %s276_s27 = scalar_lea.sflag [#allocation4], %s275_s17 }
  0x5b   : > { %s1064_s6 = scalar_lea.hbm %s1389_s30, 128  ;;  %s1069_s18 = scalar_lea.hbm %s1530_s1, 256 }
  0x5c   : > { %p1065_p1 = scmp.ne.s32.totalorder %s1389_s30, %s1064_s6  ;;  %p1066_p2 = pneg %p1395_p11 }
  0x5d   : > { %p1070_p8 = scmp.lt.u32.totalorder %s1389_s30, %s1530_s1  ;;  %p1071_p13 = scmp.lt.u32.totalorder %s1069_s18, %s1064_s6 }
  0x5e   : > { %p1067_p4 = pnand %p1066_p2, %p1065_p1  ;;  %p1073_p12 = scmp.lt.u32.totalorder %s1064_s6, %s1389_s30 }
  0x5f   : > { %p1072_p10 = por %p1071_p13, %p1070_p8 }
  0x60   : > { %p1068_p6 = pneg %p1067_p4 }
  0x61   : > { %p1074_p0 = por %p1073_p12, %p1072_p10 }
  0x63   : > { %p1075_p5 = pnand %p1074_p0, %p1068_p6 }
  0x65   : > { %1078 = shalt.err (!%p1075_p5)
}
  0x66   : > { %s1079_s17 = scalar_lea.vmem %s1391_s21, 128  ;;  %s1191_s19 = smov [#allocation7]  }
  0x67   : > { %p1080_p7 = scmp.ne.s32.totalorder %s1391_s21, %s1079_s17  ;;  %s1084_s28 = sshll.u32 %s1191_s19, 4  ;;  %s1085_s28 = int_to_ptr.vmem [resolvable:$false] %s1084_s28 }
  0x68   : > { %s1086_s10 = scalar_lea.vmem %s1085_s28, 256  ;;  %p1087_p4 = scmp.lt.s32.totalorder %s1391_s21, %s1085_s28 }
  0x69   : > { %p1082_p9 = pnand %p1080_p7, %p1066_p2  ;;  %p1088_p8 = scmp.lt.s32.totalorder %s1086_s10, %s1079_s17 }
  0x6b   : > { %p1083_p1 = pneg %p1082_p9  ;;  %p1089_p13 = por %p1088_p8, %p1087_p4 }
  0x6d   : > { %p1090_p10 = pnand %p1089_p13, %p1083_p1 }
  0x6f   : > { %1093 = shalt.err (!%p1090_p10)
}
  0x70   : > { %918 = dma.hbm_to_vmem [thread:$0]  (!%p1395_p11), %s1389_s30, 128, %s1391_s21, %s276_s27  }
  0x71   : > { %p1556_p6 = scmp.ne.s32.totalorder %s1550_s9, 0 }
  0x72   : > { %p1557_p2 = scmp.ne.s32.totalorder (!%p1556_p6), %s1545_s29, 0 }
  0x73   : > { %295 = sbr.rel (%p1556_p6) target bundleno = 671 (0x29f), region = 44 }
  0x7a   : > { %1147 = dma.done.wait (%p1557_p2), [#allocation6], 16  }
  0x7b   : > { %1149 = vsyncadd (%p1557_p2), [#allocation6], 4294967280  ;;  %s1431_s6 = sand.u32 1, %s1168_s22   ;;  %p1558_p11 = scmp.ne.s32.totalorder %s1547_s7, 0 }
  0x7c   : > { %s724_s8 = sshll.u32 %s1431_s6, 3  ;;  %s302_s11 = scalar_lea.sflag [#allocation4], %s1431_s6 }
  0x7d   : > { %s1437_s30 = scalar_lea.vmem [#allocation7], %s724_s8 }
  0x7e   : > { %1151 = dma.done.wait (%p1558_p11), %s302_s11, 128  }
  0x7f   : > { %1153 = vsyncadd (%p1558_p11), %s302_s11, 4294967168 }
  0x80   : > { %1155 = dma.done.wait (%p1557_p2), [#allocation9], 4096  }
  0x81   : > { %1157 = vsyncadd (%p1557_p2), [#allocation9], 4294963200 }
  0x82   : > { %318 = sfence }
  0x83   : > { %v356_v0 = vld [vmem:[#allocation8] sm:$0xff]  ;;  %v357_v1 = vld [vmem:[#allocation8 + $0x8] sm:$0xff]  ;;  %v358_v2 = vld [vmem:[#allocation8 + $0x10] sm:$0xff]  ;;  %v1192_v3 = vmov 0.0|0.0   ;;  %vm1193_vm0 = vmmov 0   ;;  %v1194_v6 = vmov 0.0  }
  0x84   : > { %841 = vmatprep.subr.bf16.mxu0 %v1192_v3  ;;  %v842_v4 = vpack.c.bf16 %v357_v1, %v356_v0  ;;  %v359_v5 = vld [vmem:[#allocation8 + $0x18] sm:$0xff]  ;;  %803 = vmatprep.mubr.msk.f32.mxu0 %vm1193_vm0, %v1194_v6  ;;  %v360_v8 = vld [vmem:[#allocation8 + $0x20] sm:$0xff]  ;;  %v361_v9 = vld [vmem:[#allocation8 + $0x28] sm:$0xff]  ;;  %s449_s29 = sld [smem:[#allocation3]]  ;;  %s731_s21 = sld [smem:[#allocation3 + $0x1]] }
  0x85   : > { %865 = vmatprep.subr.bf16.mxu1 %v1192_v3  ;;  %838 = vmatprep.mubr.msk.f32.mxu1 %vm1193_vm0, %v1194_v6  ;;  %v845_v7 = vpack.c.bf16 %v359_v5, %v358_v2  ;;  %v848_v10 = vpack.c.bf16 %v361_v9, %v360_v8  ;;  %v362_v11 = vld [vmem:[#allocation8 + $0x30] sm:$0xff]  ;;  %v363_v12 = vld [vmem:[#allocation8 + $0x38] sm:$0xff]  ;;  %v364_v14 = vld [vmem:[#allocation8 + $0x40] sm:$0xff]  ;;  %s734_s18 = sshll.u32 %s1176_s24, 7  ;;  %s345_s14 = scalar_lea.vmem [#allocation11], %s724_s8 }
  0x86   : > { %843 = vmatpush3.bf16.msra.mxu0 %v842_v4  ;;  %v851_v13 = vpack.c.bf16 %v363_v12, %v362_v11  ;;  %v365_v15 = vld [vmem:[#allocation8 + $0x48] sm:$0xff]  ;;  %v366_v17 = vld [vmem:[#allocation8 + $0x50] sm:$0xff]  ;;  %v367_v18 = vld [vmem:[#allocation8 + $0x58] sm:$0xff]  ;;  %s587_s13 = sshll.u32 %s345_s14, 4  ;;  %s1559_s28 = sld [smem:[#allocation18_spill]]  ;;  %s1482_s13 = int_to_ptr.vmem [resolvable:$true] %s587_s13 }
  0x87   : > { %844 = vmatprep.subr.bf16.mxu0 %v1192_v3  ;;  %v854_v16 = vpack.c.bf16 %v365_v15, %v364_v14  ;;  %v857_v19 = vpack.c.bf16 %v367_v18, %v366_v17  ;;  %v368_v20 = vld [vmem:[#allocation8 + $0x60] sm:$0xff]  ;;  %v369_v21 = vld [vmem:[#allocation8 + $0x68] sm:$0xff]  ;;  %v370_v23 = vld [vmem:[#allocation8 + $0x70] sm:$0xff]  ;;  %s574_s11 = scalar_lea.sflag [#allocation5], %s1431_s6  ;;  %s1195_s24 = smov [#allocation11]  }
  0x88   : > { %v860_v22 = vpack.c.bf16 %v369_v21, %v368_v20  ;;  %v371_v24 = vld [vmem:[#allocation8 + $0x78] sm:$0xff]  ;;  %v460_v27 = vld [vmem:[#allocation10] sm:$0xff]  ;;  %v461_v28 = vld [vmem:[#allocation10 + $0x8] sm:$0xff]  ;;  %s1098_s8 = sshll.u32 %s1195_s24, 4  ;;  %s1099_s8 = int_to_ptr.vmem [resolvable:$false] %s1098_s8 }
  0x89   : > { %v863_v25 = vpack.c.bf16 %v371_v24, %v370_v23  ;;  %v1457_v26 = vld [vmem:[%s1437_s30] sm:$0xff]  ;;  %v866_v29 = vpack.c.bf16 %v461_v28, %v460_v27  ;;  %v464_v33 = vld [vmem:[#allocation10 + $0x20] sm:$0xff]  ;;  %v465_v34 = vld [vmem:[#allocation10 + $0x28] sm:$0xff]  ;;  %s1094_s30 = scalar_lea.vmem %s1482_s13, 128  ;;  %p1101_p7 = scmp.lt.s32.totalorder %s1482_s13, %s1099_s8 }
  0x8a   : > { %846 = vmatpush3.bf16.msra.mxu0 %v845_v7  ;;  %v462_v30 = vld [vmem:[#allocation10 + $0x10] sm:$0xff]  ;;  %v463_v31 = vld [vmem:[#allocation10 + $0x18] sm:$0xff]  ;;  %v872_v35 = vpack.c.bf16 %v465_v34, %v464_v33  ;;  %v468_v39 = vld [vmem:[#allocation10 + $0x40] sm:$0xff]  ;;  %v450_v53 = vstv %s449_s29  ;;  %v561_v0 = vstv %s731_s21  ;;  %p1095_p12 = scmp.ne.s32.totalorder %s1482_s13, %s1094_s30  ;;  %s1100_s29 = scalar_lea.vmem %s1099_s8, 256 }
  0x8b   : > { %847 = vmatprep.subr.bf16.mxu0 %v1192_v3  ;;  %867 = vmatpush3.bf16.msra.mxu1 %v866_v29  ;;  %v869_v32 = vpack.c.bf16 %v463_v31, %v462_v30  ;;  %v466_v36 = vld [vmem:[#allocation10 + $0x30] sm:$0xff]  ;;  %v467_v37 = vld [vmem:[#allocation10 + $0x38] sm:$0xff]  ;;  %v469_v40 = vld [vmem:[#allocation10 + $0x48] sm:$0xff]  ;;  %p1102_p9 = scmp.lt.s32.totalorder %s1100_s29, %s1094_s30 }
  0x8c   : > { %868 = vmatprep.subr.bf16.mxu1 %v1192_v3  ;;  %v875_v38 = vpack.c.bf16 %v467_v37, %v466_v36  ;;  %v878_v41 = vpack.c.bf16 %v469_v40, %v468_v39  ;;  %v470_v42 = vld [vmem:[#allocation10 + $0x50] sm:$0xff]  ;;  %v471_v43 = vld [vmem:[#allocation10 + $0x58] sm:$0xff]  ;;  %v472_v45 = vld [vmem:[#allocation10 + $0x60] sm:$0xff]  ;;  %s1480_s10 = scalar_lea.hbm %s1559_s28, %s734_s18  ;;  %p1096_p0 = pnand %p1095_p12, %p1372_p3 }
  0x8d   : > { %v881_v44 = vpack.c.bf16 %v471_v43, %v470_v42  ;;  %v473_v46 = vld [vmem:[#allocation10 + $0x68] sm:$0xff]  ;;  %v474_v48 = vld [vmem:[#allocation10 + $0x70] sm:$0xff]  ;;  %v475_v49 = vld [vmem:[#allocation10 + $0x78] sm:$0xff]  ;;  %p1103_p1 = por %p1102_p9, %p1101_p7 }
  0x8e   : > { %849 = vmatpush3.bf16.msra.mxu0 %v848_v10  ;;  %v884_v47 = vpack.c.bf16 %v473_v46, %v472_v45  ;;  %v887_v50 = vpack.c.bf16 %v475_v49, %v474_v48  ;;  %v728_v51 = vld [vmem:[%s1532_s3] ss:$0 sm:$0xff]  ;;  %p1097_p5 = pneg %p1096_p0 }
  0x8f   : > { %850 = vmatprep.subr.bf16.mxu0 %v1192_v3  ;;  %870 = vmatpush3.bf16.msra.mxu1 %v869_v32  ;;  %v730_v62 = vld [vmem:[%s1534_s5] ss:$0 sm:$0xff] }
  0x90   : > { %871 = vmatprep.subr.bf16.mxu1 %v1192_v3  ;;  %p1104_p4 = pnand %p1103_p1, %p1097_p5 }
  0x92   : > { %852 = vmatpush3.bf16.msra.mxu0 %v851_v13 }
  0x93   : > { %853 = vmatprep.subr.bf16.mxu0 %v1192_v3  ;;  %873 = vmatpush3.bf16.msra.mxu1 %v872_v35 }
  0x94   : > { %874 = vmatprep.subr.bf16.mxu1 %v1192_v3 }
  0x96   : > { %855 = vmatpush3.bf16.msra.mxu0 %v854_v16 }
  0x97   : > { %856 = vmatprep.subr.bf16.mxu0 %v1192_v3  ;;  %876 = vmatpush3.bf16.msra.mxu1 %v875_v38 }
  0x98   : > { %877 = vmatprep.subr.bf16.mxu1 %v1192_v3 }
  0x9a   : > { %858 = vmatpush3.bf16.msra.mxu0 %v857_v19 }
  0x9b   : > { %859 = vmatprep.subr.bf16.mxu0 %v1192_v3  ;;  %879 = vmatpush3.bf16.msra.mxu1 %v878_v41 }
  0x9c   : > { %880 = vmatprep.subr.bf16.mxu1 %v1192_v3 }
  0x9e   : > { %861 = vmatpush3.bf16.msra.mxu0 %v860_v22 }
  0x9f   : > { %862 = vmatprep.subr.bf16.mxu0 %v1192_v3  ;;  %882 = vmatpush3.bf16.msra.mxu1 %v881_v44 }
  0xa0   : > { %883 = vmatprep.subr.bf16.mxu1 %v1192_v3 }
  0xa2   : > { %864 = vmatpush3.bf16.msra.mxu0 %v863_v25 }
  0xa3   : > { %885 = vmatpush3.bf16.msra.mxu1 %v884_v47 }
  0xa4   : > { %886 = vmatprep.subr.bf16.mxu1 %v1192_v3 }
  0xa5   : > { %804 = vmatmul.mubr.f32.vlgmr.msra.gmra.mrb[0].mxu0 %v1457_v26 }
  0xa7   : > { %888 = vmatpush3.bf16.msra.mxu1 %v887_v50 }
 0x178   : > { %v445_v52 = vpop.f32.mrb[0].mxu0 }
 0x179   : > { %v446_v54 = vadd.f32 %v728_v51, %v445_v52  ;;  %v805_v55 = vpop.f32.mrb[1].mxu0 }
 0x17b   : > { %v451_v56 = vmul.f32 %v450_v53, %v446_v54 }
 0x17d   : > { %v729_v57 = vmul.f32 -1.442695, %v451_v56 }
 0x17f   : > { %987 = vpow2.f32 %v729_v57 }
 0x189   : > { %v988_v58 = vpop.eup %987 }
 0x18a   : > { %v455_v59 = vadd.f32 1.0, %v988_v58 }
 0x18c   : > { %989 = vrcp.f32 %v455_v59 }
 0x196   : > { %v990_v60 = vpop.eup %989 }
 0x197   : > { %v458_v61 = vmul.f32 %v990_v60, %v446_v54 }
 0x199   : > { %839 = vmatmul.mubr.f32.vlgmr.msra.gmra.mrb[0].mxu1 %v458_v61 }
 0x26c   : > { %v542_v63 = vpop.f32.mrb[0].mxu1 }
 0x26d   : > { %v559_v1 = vadd.f32 %v730_v62, %v542_v63  ;;  %v840_v2 = vpop.f32.mrb[1].mxu1 }
 0x26f   : > { %v562_v3 = vmul.f32 %v561_v0, %v559_v1 }
 0x271   : > { %v732_v4 = vmul.f32 -1.442695, %v562_v3 }
 0x273   : > { %991 = vpow2.f32 %v732_v4 }
 0x27d   : > { %v992_v5 = vpop.eup %991 }
 0x27e   : > { %v566_v6 = vadd.f32 1.0, %v992_v5 }
 0x280   : > { %993 = vrcp.f32 %v566_v6 }
 0x28a   : > { %v994_v7 = vpop.eup %993 }
 0x28b   : > { %v569_v8 = vmul.f32 %v994_v7, %v559_v1 }
 0x28d   : > { %v570_v9 = vmul.f32 0.90909094, %v569_v8 }
 0x28f   : > { %v571_v10 = vadd.f32 %v570_v9, %v1457_v26 }
 0x291   : > { %572 = vst [vmem:[%s345_s14] sm:$0xff] %v571_v10 }
 0x292   : > { %1107 = shalt.err (!%p1104_p4)
}
 0x293   : > { %s1108_s6 = scalar_lea.hbm %s1480_s10, 128  ;;  %s1112_s21 = scalar_lea.hbm %s1559_s28, 256 }
 0x294   : > { %p1109_p8 = scmp.ne.s32.totalorder %s1480_s10, %s1108_s6  ;;  %p1113_p6 = scmp.lt.u32.totalorder %s1480_s10, %s1559_s28 }
 0x295   : > { %p1114_p2 = scmp.lt.u32.totalorder %s1112_s21, %s1108_s6  ;;  %p1116_p12 = scmp.lt.u32.totalorder %s1108_s6, %s1480_s10 }
 0x296   : > { %p1110_p13 = pnand %p1109_p8, %p1372_p3 }
 0x297   : > { %p1115_p11 = por %p1114_p2, %p1113_p6 }
 0x298   : > { %p1111_p10 = pneg %p1110_p13 }
 0x299   : > { %p1117_p0 = por %p1116_p12, %p1115_p11 }
 0x29b   : > { %p1118_p5 = pnand %p1117_p0, %p1111_p10 }
 0x29d   : > { %1121 = shalt.err (!%p1118_p5)
}
 0x29e   : > { %903 = dma.vmem_to_hbm [thread:$0]  (%p1372_p3), %s1482_s13, 128, %s1480_s10, %s574_s11  }
 0x29f PF: > { %s1560_s18 = sld [smem:[#allocation16_spill]]  ;;  %s1561_s14 = sld [smem:[#allocation17_spill]] }
 0x2a0   : > { %p1563_p9 = scmp.ge.s32.totalorder %s1184_s26, 2 }
 0x2a5   : > { %s599_s17 = sand.u32 1, %s1560_s18   ;;  %p1562_p7 = scmp.ne.s32.totalorder %s1561_s14, 0 }
 0x2a6   : > { %s600_s19 = scalar_lea.sflag [#allocation5], %s599_s17 }
 0x2a7   : > { %p920_p1 = pnand %p1563_p9, %p1562_p7 }
 0x2a9   : > { %1159 = dma.done.wait (!%p920_p1), %s600_s19, 128  }
 0x2aa   : > { %1161 = vsyncadd (!%p920_p1), %s600_s19, 4294967168  ;;  %s24_s26 = sadd.s32 1, %s1184_s26   ;;  %s1564_s21 = smov %s1168_s22 }
 0x2ab   : > { %p21_p4 = scmp.ge.s32.totalorder %s24_s26, 4   ;;  %s1565_s22 = smov %s1172_s23 }
 0x2ac   : > { %s1566_s23 = smov %s1384_s15  ;;  %s1567_s24 = smov %s1180_s25 }
 0x2ad   : > { %s1568_s25 = smov %s1570_s12  ;;  %23 = sbr.rel (!%p21_p4) target bundleno = 10 (0xa), region = 115 }
 0x2b4   :  { %605 = vsyncpa [#allocation4], 1 }
 0x2b5   :  { %607 = vsyncpa [#allocation4 + $0x1], 1 }
 0x2b6   :  { %608 = vsyncpa [#allocation9], 1 }
 0x2b7   :  { %609 = vsyncpa [#allocation5], 1 }
 0x2b8   :  { %611 = vsyncpa [#allocation5 + $0x1], 1 }
 0x2b9   :  { %612 = vsyncpa [#allocation6], 1 }
 0x2ba   :  { %614 = vsyncpa [#allocation6 + $0x1], 1 }

</bundles_post_ra>
